<compile_context>
chip_gen: v7x
topology: tpu7x:2x2x1
jax: 0.10.0
libtpu: 0.0.40
codegen_flags: <defaults>
</compile_context>

<pallas_src>
from functools import partial

import numpy as np
import jax
import jax.numpy as jnp
from jax.experimental import pallas as pl
from jax.experimental.pallas import tpu as pltpu


def _round_up(v, m):
    return ((v + m - 1) // m) * m


def _lane_pad(d):
    # Lane-dense (128); use full 256-wide MXU blocks on v6e/v7x when the dim is
    # already larger than one lane group (avoids 8x padding waste on tiny dims).
    return _round_up(d, 256) if d > 128 else _round_up(d, 128)


def patch_embed_kernel(x_ref, w_ref, b_ref, o_ref):
    # x_ref: (TM, Kp) bf16 patch tile (streams over M)
    # w_ref: (Kp, Ep) bf16 projection weight (resident across the grid)
    # b_ref: (1,  Ep) f32 bias (resident)
    # o_ref: (TM, Ep) output tile (bf16 by default; f32 accumulation here)
    acc = jnp.dot(x_ref[...], w_ref[...], preferred_element_type=jnp.float32)
    o_ref[...] = (acc + b_ref[...]).astype(o_ref.dtype)


@partial(jax.jit, static_argnames=("patch_size", "out_dtype"))
def patch_embed(x, weight, bias, patch_size, out_dtype=jnp.bfloat16):
    """x: (B, C, H, W) NCHW; weight: (E, C, P, P); bias: (E,). Returns (B, N, E)."""
    B, C, H, W = x.shape
    E = weight.shape[0]
    P = patch_size
    gh, gw = H // P, W // P
    N = gh * gw
    K = C * P * P
    M = B * N

    # --- glue: extract non-overlapping patches, flatten in (C, Ph, Pw) order --
    # (Offered to XLA for fusion into the kernel's input DMA via
    #  allow_input_fusion below.)
    patches = x.reshape(B, C, gh, P, gw, P)
    patches = jnp.transpose(patches, (0, 2, 4, 1, 3, 5))    # (B, gh, gw, C, P, P)
    patches = patches.reshape(M, K)                          # (M, K)

    # conv weight (E, C, P, P) -> (K, E); ordering matches patch flattening
    w2d = weight.reshape(E, K).T                             # (K, E)

    # --- lane/MXU-friendly padding on the contraction and embed dims ---------
    Kp = _lane_pad(K)
    Ep = _lane_pad(E)
    if Kp != K:
        patches = jnp.pad(patches, ((0, 0), (0, Kp - K)))    # zero pad: no-op in dot
        w2d = jnp.pad(w2d, ((0, Kp - K), (0, 0)))
    if Ep != E:
        w2d = jnp.pad(w2d, ((0, 0), (0, Ep - E)))
    b2d = jnp.pad(bias, (0, Ep - E)).reshape(1, Ep).astype(jnp.float32)

    # bf16 matmul inputs, f32 accumulation inside the kernel.
    patches = patches.astype(jnp.bfloat16)
    w2d = w2d.astype(jnp.bfloat16)

    # --- budget-driven M tiling ----------------------------------------------
    try:
        vmem_cap = int(pltpu.get_tpu_info().vmem_capacity_bytes)
    except Exception:
        vmem_cap = 64 * 1024 * 1024                 # conservative (v7x) default
    out_bytes = int(np.dtype(out_dtype).itemsize)
    budget = (3 * vmem_cap) // 8                    # pipelined working-set budget
    fixed = 2 * (Kp * Ep * 2 + Ep * 4)              # (double-buffered) weight + bias
    per_row = 2 * (Kp * 2 + Ep * out_bytes)         # double-buffered in + out tile
    tm = max(8, min(2048, ((budget - fixed) // per_row) // 8 * 8))
    TM = min(tm, _round_up(M, 8))

    grid = (pl.cdiv(M, TM),)                        # ragged last tile masked by Pallas

    cost = pl.CostEstimate(
        flops=2 * M * Kp * Ep,
        transcendentals=0,
        bytes_accessed=M * Kp * 2 + Kp * Ep * 2 + Ep * 4 + M * Ep * out_bytes,
    )

    out = pl.pallas_call(
        patch_embed_kernel,
        out_shape=jax.ShapeDtypeStruct((M, Ep), out_dtype),
        grid=grid,
        in_specs=[
            pl.BlockSpec((TM, Kp), lambda i: (i, 0)),   # patch tile, streams over M
            pl.BlockSpec((Kp, Ep), lambda i: (0, 0)),   # weight, resident
            pl.BlockSpec((1, Ep), lambda i: (0, 0)),    # bias, resident
        ],
        out_specs=pl.BlockSpec((TM, Ep), lambda i: (i, 0)),
        compiler_params=pltpu.CompilerParams(
            dimension_semantics=("parallel",),          # shard M tiles across TCs
            vmem_limit_bytes=min((3 * vmem_cap) // 4, 100 * 1024 * 1024),
            allow_input_fusion=[True, False, False],    # fuse patch extraction in
        ),
        cost_estimate=cost,
    )(patches, w2d, b2d)

    if Ep != E:
        out = out[:, :E]
    return out.reshape(B, N, E)


def reference_patch_embed(x, weight, bias, patch_size):
    """Pure-JAX reference: conv2d with stride == kernel, NCHW."""
    y = jax.lax.conv_general_dilated(
        x, weight,
        window_strides=(patch_size, patch_size),
        padding="VALID",
        dimension_numbers=("NCHW", "OIHW", "NCHW"),
    )
    y = y + bias.reshape(1, -1, 1, 1)
    B, E, gh, gw = y.shape
    return y.reshape(B, E, gh * gw).transpose(0, 2, 1)  # (B, N, E)


if __name__ == "__main__":
    # Small config consistent with the module: img_size=16, patch_size=4,
    # in_c=4, embed_dim=32  ->  num_patches = 16, patch_dim = 64.
    B, C, H, P, E = 2, 4, 16, 4, 32

    key = jax.random.PRNGKey(0)
    kx, kw, kb = jax.random.split(key, 3)
    x = jax.random.normal(kx, (B, C, H, H), dtype=jnp.float32)
    weight = jax.random.normal(kw, (E, C, P, P), dtype=jnp.float32) * 0.02
    bias = jax.random.normal(kb, (E,), dtype=jnp.float32) * 0.02

    out = patch_embed(x, weight, bias, P)              # bf16 out, f32 accumulation
    out = jax.block_until_ready(out)

    ref = reference_patch_embed(x, weight, bias, P)
    assert out.shape == (B, (H // P) * (H // P), E), out.shape
    # bf16 matmul inputs / bf16 output with f32 accumulation -> modest tolerance.
    assert jnp.allclose(out.astype(jnp.float32), ref, atol=2e-2, rtol=2e-2), \
        "mismatch vs reference"

    print("KERNEL_OK")
</pallas_src>

<mosaic_0001>
module attributes {stable_mosaic.version = 11 : i64} {
  func.func @patch_embed_kernel(%arg0: i32, %arg1: memref<32x128xbf16, #tpu.memory_space<vmem>>, %arg2: memref<128x128xbf16, #tpu.memory_space<vmem>>, %arg3: memref<1x128xf32, #tpu.memory_space<vmem>>, %arg4: memref<32x128xbf16, #tpu.memory_space<vmem>>) attributes {dimension_semantics = [#tpu.dimension_semantics<parallel>], iteration_bounds = array<i64: 1>, scalar_prefetch = 0 : i64, scratch_operands = 0 : i64, tpu.core_type = #tpu.core_type<tc>, window_params = [{transform_indices = @transform_0, window_bounds = array<i64: 32, 128>}, {pipeline_mode = #tpu.pipeline_mode<synchronous>, transform_indices = @transform_1, window_bounds = array<i64: 128, 128>}, {pipeline_mode = #tpu.pipeline_mode<synchronous>, transform_indices = @transform_2, window_bounds = array<i64: 1, 128>}, {transform_indices = @transform_3, window_bounds = array<i64: 32, 128>}]} {
    %c0 = arith.constant 0 : index
    %c0_0 = arith.constant 0 : index
    %0 = vector.load %arg1[%c0, %c0_0] : memref<32x128xbf16, #tpu.memory_space<vmem>>, vector<32x128xbf16>
    %c0_1 = arith.constant 0 : index
    %c0_2 = arith.constant 0 : index
    %1 = vector.load %arg2[%c0_1, %c0_2] : memref<128x128xbf16, #tpu.memory_space<vmem>>, vector<128x128xbf16>
    %cst = arith.constant dense<0.000000e+00> : vector<32x128xf32>
    %2 = tpu.matmul %0, %1, %cst {dimension_numbers = #tpu.dot_dimension_numbers<[1], [0], [0], [1], [0, 0, 1, 1], [], []>} : vector<32x128xbf16>, vector<128x128xbf16>, vector<32x128xf32> -> vector<32x128xf32>
    %c0_3 = arith.constant 0 : index
    %c0_4 = arith.constant 0 : index
    %3 = vector.load %arg3[%c0_3, %c0_4] : memref<1x128xf32, #tpu.memory_space<vmem>>, vector<1x128xf32>
    %4 = vector.broadcast %3 : vector<1x128xf32> to vector<32x128xf32>
    %5 = arith.addf %2, %4 : vector<32x128xf32>
    %6 = arith.truncf %5 : vector<32x128xf32> to vector<32x128xbf16>
    %c0_5 = arith.constant 0 : index
    %c0_6 = arith.constant 0 : index
    %7 = vector.load %arg4[%c0_5, %c0_6] : memref<32x128xbf16, #tpu.memory_space<vmem>>, vector<32x128xbf16>
    tpu.vector_store %arg4[%c0_5, %c0_6], %6 {strides = array<i32>} : memref<32x128xbf16, #tpu.memory_space<vmem>>, vector<32x128xbf16>,
    return
  }
  func.func @transform_0(%arg0: i32) -> (i32, i32) {
    %c0_i32 = arith.constant 0 : i32
    %c0_i32_0 = arith.constant 0 : i32
    return %arg0, %c0_i32 : i32, i32
  }
  func.func @transform_1(%arg0: i32) -> (i32, i32) {
    %c0_i32 = arith.constant 0 : i32
    %c0_i32_0 = arith.constant 0 : i32
    %c0_i32_1 = arith.constant 0 : i32
    return %c0_i32, %c0_i32_0 : i32, i32
  }
  func.func @transform_2(%arg0: i32) -> (i32, i32) {
    %c0_i32 = arith.constant 0 : i32
    %c0_i32_0 = arith.constant 0 : i32
    %c0_i32_1 = arith.constant 0 : i32
    return %c0_i32, %c0_i32_0 : i32, i32
  }
  func.func @transform_3(%arg0: i32) -> (i32, i32) {
    %c0_i32 = arith.constant 0 : i32
    %c0_i32_0 = arith.constant 0 : i32
    return %arg0, %c0_i32 : i32, i32
  }
}

</mosaic_0001>

<bundles_post_ra>
// kernel: patch_embed.2
= control target key start
LH: loop header
LB: loop body
LE: loop exit
PB: predicated region body
PF: predicated region fallthrough
CT: control target
= control target key end

     0   :  { %s458_s0 = inlined_call_operand.vmem [shape: bf16[128,128], index: 0, kind: input, shape index: {}]   ;;  %s459_s1 = inlined_call_operand.vmem [shape: f32[1,128], index: 1, kind: input, shape index: {}]   ;;  %s460_s2 = inlined_call_operand.vmem [shape: bf16[32,64], index: 2, kind: input, shape index: {}]   ;;  %s461_s3 = inlined_call_operand.<no memory space> [shape: bf16[], index: 3, kind: input, shape index: {}]   ;;  %s462_s4 = inlined_call_operand.hbm [shape: bf16[32,128], index: 4, kind: output, shape index: {}]  }
   0x1   :  { %v9_v0 = vstv %s461_s3 }
   0x2   :  { %v10_v1 = vunpack.i.l.bf16 %v9_v0 }
   0x3   :  { %v347_v2 = vld [vmem:[%s458_s0] sm:$0xff]   ;;  %v33_v3 = vlaneseq  ;;  %v348_v4 = vld [vmem:[%s458_s0 + $0x8] sm:$0xff]   ;;  %v349_v5 = vld [vmem:[%s458_s0 + $0x10] sm:$0xff]  }
   0x4   :  { %323 = vmatprep.subr.bf16.mxu0 %v347_v2  ;;  %v350_v7 = vld [vmem:[%s458_s0 + $0x18] sm:$0xff]   ;;  %v30_v8 = vld [vmem:[%s460_s2] sm:$0xff]   ;;  %v281_v9 = vld [vmem:[%s460_s2 + $0x8] sm:$0xff]  }
   0x5   :  { %324 = vmatpush3.bf16.msra.mxu0 %v347_v2  ;;  %v34_v6 = vand.u32 127, %v33_v3 }
   0x6   :  { %325 = vmatprep.subr.bf16.mxu0 %v348_v4 }
   0x7   :  { %vm36_vm0 = vcmp.lt.s32.totalorder %v34_v6, 64 }
   0x9   :  { %326 = vmatpush3.bf16.msra.mxu0 %v348_v4 }
   0xa   :  { %327 = vmatprep.subr.bf16.mxu0 %v349_v5 }
   0xb   :  { %14 = vsyncpa [#allocation8], 0  ;;  %v31_v10 = vunpack.c.l.bf16 %v30_v8  ;;  %v52_v11 = vunpack.c.h.bf16 %v30_v8  ;;  %v74_v12 = vunpack.c.l.bf16 %v281_v9  ;;  %v96_v13 = vunpack.c.h.bf16 %v281_v9  ;;  %v351_v18 = vld [vmem:[%s458_s0 + $0x20] sm:$0xff]   ;;  %v352_v24 = vld [vmem:[%s458_s0 + $0x28] sm:$0xff]   ;;  %s382_s11 = smov [#allocation7]  }
   0xc   :  { %v381_v19 = vmov 0.0   ;;  %v353_v25 = vld [vmem:[%s458_s0 + $0x30] sm:$0xff]   ;;  %v354_v27 = vld [vmem:[%s458_s0 + $0x38] sm:$0xff]   ;;  %v283_v30 = vld [vmem:[%s459_s1] ss:$0 sm:$0xff]  ;;  %s269_s12 = sshll.u32 %s382_s11, 4  ;;  %s270_s12 = int_to_ptr.vmem [resolvable:$true] %s269_s12 }
   0xd   :  { %328 = vmatpush3.bf16.msra.mxu0 %v349_v5  ;;  %v37_v14 = vsel %vm36_vm0, %v31_v10, %v10_v1  ;;  %v58_v15 = vsel %vm36_vm0, %v52_v11, %v10_v1  ;;  %v80_v16 = vsel %vm36_vm0, %v74_v12, %v10_v1  ;;  %v102_v17 = vsel %vm36_vm0, %v96_v13, %v10_v1  ;;  %s357_s0 = scalar_lea.vmem %s270_s12, 256  ;;  %p362_p1 = scmp.lt.s32.totalorder %s270_s12, %s270_s12 }
   0xe   :  { %329 = vmatprep.subr.bf16.mxu0 %v350_v7  ;;  %v38_v20 = vpack.c.bf16 %v381_v19, %v37_v14  ;;  %v60_v21 = vpack.c.bf16 %v381_v19, %v58_v15  ;;  %v82_v22 = vpack.c.bf16 %v381_v19, %v80_v16  ;;  %v104_v23 = vpack.c.bf16 %v381_v19, %v102_v17  ;;  %p358_p0 = scmp.ne.s32.totalorder %s270_s12, %s357_s0  ;;  %p363_p2 = scmp.lt.s32.totalorder %s357_s0, %s357_s0 }
  0x10   :  { %40 = vst [vmem:[#allocation9] sm:$0xf] %v38_v20  ;;  %62 = vst [vmem:[#allocation9 + $0x4] sm:$0xf] %v60_v21  ;;  %p364_p3 = por %p363_p2, %p362_p1 }
  0x11   :  { %84 = vst [vmem:[#allocation9 + $0x8] sm:$0xf] %v82_v22  ;;  %106 = vst [vmem:[#allocation9 + $0xc] sm:$0xf] %v104_v23  ;;  %330 = vmatpush3.bf16.msra.mxu0 %v350_v7 }
  0x12   :  { %331 = vmatprep.subr.bf16.mxu0 %v351_v18  ;;  %p365_p4 = pnand %p364_p3, %p358_p0 }
  0x15   :  { %332 = vmatpush3.bf16.msra.mxu0 %v351_v18 }
  0x16   :  { %333 = vmatprep.subr.bf16.mxu0 %v352_v24 }
  0x17   :  { %v355_v26 = vld [vmem:[#allocation9] sm:$0xff]  }
  0x18   :  { %339 = vmatprep.mubr.bf16.mxu0 %v355_v26  ;;  %v356_v28 = vld [vmem:[#allocation9 + $0x8] sm:$0xff]  }
  0x19   :  { %334 = vmatpush3.bf16.msra.mxu0 %v352_v24 }
  0x1a   :  { %335 = vmatprep.subr.bf16.mxu0 %v353_v25 }
  0x1d   :  { %336 = vmatpush3.bf16.msra.mxu0 %v353_v25 }
  0x1e   :  { %337 = vmatprep.subr.bf16.mxu0 %v354_v27 }
  0x21   :  { %338 = vmatpush3.bf16.msra.mxu0 %v354_v27 }
  0x24   :  { %340 = vmatmul.mubr.bf16.vlgmr.msra.gmra.mrb[0].mxu0 %v356_v28 }
  0xf7   :  { %v341_v29 = vpop.f32.mrb[0].mxu0 }
  0xf8   :  { %v229_v31 = vpop.f32.mrb[1].mxu0  ;;  %v238_v33 = vadd.f32 %v341_v29, %v283_v30 }
  0xf9   :  { %v342_v32 = vpop.f32.mrb[2].mxu0  ;;  %v230_v36 = vadd.f32 %v283_v30, %v229_v31 }
  0xfa   :  { %v241_v34 = vadd.f32 %v342_v32, %v283_v30  ;;  %v232_v35 = vpop.f32.mrb[3].mxu0 }
  0xfb   :  { %v233_v37 = vadd.f32 %v283_v30, %v232_v35 }
  0xfc   :  { %v310_v38 = vpack.c.bf16 %v241_v34, %v238_v33 }
  0xfd   :  { %v305_v39 = vpack.c.bf16 %v233_v37, %v230_v36 }
  0xfe   :  { %312 = vst [vmem:[#allocation7 + $0x8] sm:$0xff] %v310_v38  }
  0xff   :  { %306 = vst [vmem:[#allocation7] sm:$0xff] %v305_v39  }
 0x100   :  { %368 = shalt.err (!%p365_p4)
}
 0x101   :  { %s369_s14 = scalar_lea.hbm %s462_s4, 256 }
 0x102   :  { %p370_p5 = scmp.ne.s32.totalorder %s462_s4, %s369_s14  ;;  %p373_p6 = scmp.lt.u32.totalorder %s369_s14, %s462_s4 }
 0x104   :  { %p375_p7 = pnand %p373_p6, %p370_p5 }
 0x106   :  { %378 = shalt.err (!%p375_p7)
}
 0x107   :  { %s383_s19 = smov 64   ;;  %s384_s20 = smov 4  }
 0x108   :  { %275 = dma.vmem_to_hbm [thread:$0]  %s270_s12, 256, %s462_s4, [#allocation8], %s383_s19, %s383_s19, %s384_s20  }
 0x109   :  { %379 = dma.done.wait [#allocation8], 256  }
 0x10a   :  { %380 = vsyncadd [#allocation8], 4294967040 }
 0x10b   :  { %279 = vsyncpa [#allocation8], 1 }

</bundles_post_ra>
